<compile_context>
chip_gen: v6e
topology: v6e:2x2x1
jax: 0.10.0
libtpu: 0.0.40
codegen_flags: <defaults>
</compile_context>

<pallas_src>
import jax
import jax.numpy as jnp
import numpy as np
from jax.experimental import pallas as pl
from jax.experimental.pallas import tpu as pltpu

NEG_SLOPE = 0.01  # PyTorch default for F.leaky_relu / nn.LeakyReLU


def _lrelu(x):
    return jnp.where(x >= 0, x, NEG_SLOPE * x)


def _round_up(x, m):
    return ((x + m - 1) // m) * m


# --------------------------------------------------------------------------- #
# Pallas kernel: GCN aggregate + encoder + decoder + discriminator, fully fused.
# Shapes are tiny, so every array is a single whole-array VMEM block (no grid).
# --------------------------------------------------------------------------- #
def make_aae_gcn_kernel(bsz, n_input, n_z, out_w, layers):
    """layers: tuple of (w_row_offset, k_padded, n_out, bias_row), 7 entries."""
    n_last = layers[-1][2]  # n_input + 1 (dec_h3 | discriminator logit)

    def kernel(xn_ref, bias_ref, w_ref, out_ref):
        def mm_bias(a, lay):
            off, kp, n, brow = lay
            ab = a.astype(jnp.bfloat16)
            if ab.shape[1] < kp:
                # zero-pad the contraction dim up to the slab's 16-row packing;
                # the padded slab rows are zeros, so the result is unchanged.
                ab = jnp.concatenate(
                    [ab, jnp.zeros((bsz, kp - ab.shape[1]), jnp.bfloat16)],
                    axis=1)
            acc = jnp.dot(ab, w_ref[off:off + kp, :n],
                          preferred_element_type=jnp.float32)
            return acc + bias_ref[brow:brow + 1, :n]

        # data = data + randn(data.shape) * 0.1 (data | noise stacked on sublanes)
        x = xn_ref[:bsz, :] + 0.1 * xn_ref[bsz:2 * bsz, :]

        # GCNConv(1,1,improved=True), vectorised over the batch:
        #   y_i = leaky_relu( M @ (x_i * w_gcn) + b_gcn )^T     (mg = w_gcn * M^T)
        g = _lrelu(mm_bias(x, layers[0]))

        # encoder
        h1 = _lrelu(mm_bias(g, layers[1]))
        h2 = _lrelu(mm_bias(h1, layers[2]))
        z = _lrelu(mm_bias(h2, layers[3]))            # enc_h3 == z

        # z feeds dec_1 AND discriminator layer 1 -> one merged matmul
        v1 = _lrelu(mm_bias(z, layers[4]))            # [dec_h1 | disc_h1]
        # block-diagonal tails: decoder and discriminator advance together
        v2 = _lrelu(mm_bias(v1, layers[5]))           # [dec_h2 | disc_h2]
        r3 = mm_bias(v2, layers[6])                   # [dec_h3_pre | disc_logit]

        # activate the contiguous [dec_h3 | d] lanes with one select
        lane = jax.lax.broadcasted_iota(jnp.int32, r3.shape, 1)
        ud = jnp.where(lane < n_input, _lrelu(r3), jax.nn.sigmoid(r3))

        # lane-dense combined output slab: [ dec_h3 | d | z | zero pad ]
        parts = [ud, z]
        used = n_last + n_z
        if out_w > used:
            parts.append(jnp.zeros((bsz, out_w - used), jnp.float32))
        out_ref[...] = jnp.concatenate(parts, axis=1)

    return kernel


def aae_gcn_forward(data, noise, m_t, params):
    """m_t is the dense transposed normalised adjacency M^T (out = x @ M^T)."""
    B, n_input = data.shape
    n_enc_1 = params["e1w"].shape[1]
    n_enc_2 = params["e2w"].shape[1]
    n_z = params["e3w"].shape[1]
    n_dec_2 = params["d1w"].shape[1]
    n_dec_1 = params["d2w"].shape[1]
    hidden = params["q1w"].shape[1]

    # ---- weights: fold gcn_w, merge z-consumers, block-diag the tails -------
    mg = m_t * params["gcn_w"][0, 0]                                   # (ni, ni)
    zw = jnp.concatenate([params["d1w"], params["q1w"]], axis=1)       # (nz, nd2+h)
    w2 = jax.scipy.linalg.block_diag(params["d2w"], params["q2w"])     # (nd2+h, nd1+h)
    w3 = jax.scipy.linalg.block_diag(params["d3w"], params["q3w"])     # (nd1+h, ni+1)
    weights = [mg, params["e1w"], params["e2w"], params["e3w"], zw, w2, w3]
    n_outs = [n_input, n_enc_1, n_enc_2, n_z,
              n_dec_2 + hidden, n_dec_1 + hidden, n_input + 1]

    # ---- one bf16 weight slab: K padded to 16 sublanes, lanes padded to 128 -
    w_slab_w = _round_up(max(w.shape[1] for w in weights), 128)
    w_offs, blocks, cur = [], [], 0
    for w in weights:
        kp = _round_up(w.shape[0], 16)
        w_offs.append(cur)
        blocks.append(jnp.pad(w.astype(jnp.bfloat16),
                              ((0, kp - w.shape[0]), (0, w_slab_w - w.shape[1]))))
        cur += kp
    w_slab = jnp.concatenate(blocks, axis=0)

    # ---- one f32 bias slab (row 0 = gcn_b broadcast) -------------------------
    bias_rows = [
        jnp.full((1, n_input), params["gcn_b"][0, 0], jnp.float32),
        params["e1b"], params["e2b"], params["e3b"],
        jnp.concatenate([params["d1b"], params["q1b"]], axis=1),
        jnp.concatenate([params["d2b"], params["q2b"]], axis=1),
        jnp.concatenate([params["d3b"], params["q3b"]], axis=1),
    ]
    bias_w = _round_up(max(r.shape[1] for r in bias_rows), 128)
    bias_slab = jnp.concatenate(
        [jnp.pad(r.astype(jnp.float32), ((0, 0), (0, bias_w - r.shape[1])))
         for r in bias_rows], axis=0)
    bias_slab = jnp.pad(
        bias_slab, ((0, _round_up(len(bias_rows), 8) - len(bias_rows)), (0, 0)))

    # ---- data | noise stacked on the sublane (batch) axis: one DMA ----------
    # TODO(synk): noise could instead be generated in-kernel with
    # pltpu.prng_seed + pltpu.stateful_normal; kept external for a
    # deterministic comparison against the pure-JAX reference.
    xn = jnp.concatenate([data, noise], axis=0).astype(jnp.float32)    # (2B, ni)

    layers = tuple((w_offs[i], _round_up(weights[i].shape[0], 16), n_outs[i], i)
                   for i in range(7))
    out_w = _round_up(n_input + 1 + n_z, 128)

    kernel = make_aae_gcn_kernel(B, n_input, n_z, out_w, layers)

    flops = 2 * B * sum(weights[i].shape[0] * n_outs[i] for i in range(7))
    bytes_accessed = int(2 * B * n_input * 4
                         + int(np.prod(bias_slab.shape)) * 4
                         + int(np.prod(w_slab.shape)) * 2
                         + B * out_w * 4)

    vmem = pl.BlockSpec(memory_space=pltpu.MemorySpace.VMEM)
    slab = pl.pallas_call(
        kernel,
        out_shape=jax.ShapeDtypeStruct((B, out_w), jnp.float32),
        in_specs=[vmem, vmem, vmem],
        out_specs=vmem,
        cost_estimate=pl.CostEstimate(
            flops=flops, transcendentals=B * (n_input + 1),
            bytes_accessed=bytes_accessed),
    )(xn, bias_slab, w_slab)

    dec_h3 = slab[:, :n_input]
    d = slab[:, n_input:n_input + 1]
    z = slab[:, n_input + 1:n_input + 1 + n_z]
    return dec_h3, z, d


# --------------------------------------------------------------------------- #
# Glue: dense (transposed) GCN normalisation and parameter init.
# --------------------------------------------------------------------------- #
def gcn_norm_dense_t(edge_index, num_nodes, improved=True):
    """Dense M^T built directly (no transpose pass), M = D^-1/2 (A+fill*I) D^-1/2,
    matching PyG gcn_norm with add_remaining_self_loops.  out_rows = x_rows @ M^T."""
    row, col = edge_index[0], edge_index[1]          # messages flow row -> col
    fill = 2.0 if improved else 1.0
    at = jnp.zeros((num_nodes, num_nodes), jnp.float32)
    at = at.at[row, col].add(1.0)                    # A^T[source, target]
    diag = jnp.diagonal(at)
    at = at + jnp.diag(jnp.where(diag > 0, 0.0, fill))   # remaining self-loops
    deg = at.sum(axis=0)                             # in-degree (+ self-loops)
    dinv = jnp.where(deg > 0, jax.lax.rsqrt(deg), 0.0)
    return dinv[:, None] * at * dinv[None, :]


def init_params(key, n_enc_1, n_enc_2, n_dec_1, n_dec_2, n_input, n_z, hidden_dim):
    dims = [
        ("e1", n_input, n_enc_1), ("e2", n_enc_1, n_enc_2), ("e3", n_enc_2, n_z),
        ("d1", n_z, n_dec_2), ("d2", n_dec_2, n_dec_1), ("d3", n_dec_1, n_input),
        ("q1", n_z, hidden_dim), ("q2", hidden_dim, hidden_dim), ("q3", hidden_dim, 1),
    ]
    keys = jax.random.split(key, 2 * len(dims) + 1)
    params = {}
    for i, (name, din, dout) in enumerate(dims):
        bound = 1.0 / np.sqrt(din)   # PyTorch nn.Linear default init range
        params[name + "w"] = jax.random.uniform(
            keys[2 * i], (din, dout), jnp.float32, -bound, bound)
        params[name + "b"] = jax.random.uniform(
            keys[2 * i + 1], (1, dout), jnp.float32, -bound, bound)
    # GCNConv(1, 1): weight (1,1), bias zeros
    params["gcn_w"] = jax.random.normal(keys[-1], (1, 1), jnp.float32)
    params["gcn_b"] = jnp.zeros((1, 1), jnp.float32)
    return params


def reference_forward(data, noise, m_t, params):
    hp = jax.lax.Precision.HIGHEST
    dot = lambda a, b: jnp.dot(a, b, precision=hp)
    x = data + 0.1 * noise
    g = _lrelu(dot(x, m_t) * params["gcn_w"][0, 0] + params["gcn_b"][0, 0])
    h1 = _lrelu(dot(g, params["e1w"]) + params["e1b"])
    h2 = _lrelu(dot(h1, params["e2w"]) + params["e2b"])
    z = _lrelu(dot(h2, params["e3w"]) + params["e3b"])
    u1 = _lrelu(dot(z, params["d1w"]) + params["d1b"])
    u2 = _lrelu(dot(u1, params["d2w"]) + params["d2b"])
    u3 = _lrelu(dot(u2, params["d3w"]) + params["d3b"])
    q1 = _lrelu(dot(z, params["q1w"]) + params["q1b"])
    q2 = _lrelu(dot(q1, params["q2w"]) + params["q2b"])
    d = jax.nn.sigmoid(dot(q2, params["q3w"]) + params["q3b"])
    return u3, z, d


if __name__ == "__main__":
    # small shapes consistent with the module
    B, n_input = 8, 16
    n_enc_1, n_enc_2, n_z = 32, 16, 8
    n_dec_1, n_dec_2 = 32, 16
    hidden_dim = 32

    key = jax.random.PRNGKey(0)
    k_data, k_noise, k_param = jax.random.split(key, 3)
    data = jax.random.normal(k_data, (B, n_input), jnp.float32)
    noise = jax.random.normal(k_noise, (B, n_input), jnp.float32)

    # bidirectional ring graph over the n_input nodes
    src = np.arange(n_input)
    dst = (src + 1) % n_input
    edge_index = jnp.asarray(
        np.stack([np.concatenate([src, dst]), np.concatenate([dst, src])]),
        dtype=jnp.int32)

    m_t = gcn_norm_dense_t(edge_index, n_input, improved=True)
    params = init_params(k_param, n_enc_1, n_enc_2, n_dec_1, n_dec_2,
                         n_input, n_z, hidden_dim)

    fwd = jax.jit(aae_gcn_forward)
    dec_h3, z, d = fwd(data, noise, m_t, params)
    jax.block_until_ready((dec_h3, z, d))

    ref_dec, ref_z, ref_d = reference_forward(data, noise, m_t, params)
    # kernel uses bf16 MXU operands (f32 accumulation) vs f32-HIGHEST reference,
    # so the tolerance is widened accordingly.
    np.testing.assert_allclose(np.asarray(dec_h3), np.asarray(ref_dec),
                               rtol=3e-2, atol=3e-2)
    np.testing.assert_allclose(np.asarray(z), np.asarray(ref_z),
                               rtol=3e-2, atol=3e-2)
    np.testing.assert_allclose(np.asarray(d), np.asarray(ref_d),
                               rtol=3e-2, atol=3e-2)

    print("KERNEL_OK")
</pallas_src>

<mosaic_0001>
module attributes {stable_mosaic.version = 11 : i64} {
  func.func @kernel(%arg0: memref<16x16xf32, #tpu.memory_space<vmem>>, %arg1: memref<8x128xf32, #tpu.memory_space<vmem>>, %arg2: memref<208x128xbf16, #tpu.memory_space<vmem>>, %arg3: memref<8x128xf32, #tpu.memory_space<vmem>>) attributes {dimension_semantics = [], scalar_prefetch = 0 : i64, scratch_operands = 0 : i64, tpu.core_type = #tpu.core_type<tc>} {
    %c0 = arith.constant 0 : index
    %c0_0 = arith.constant 0 : index
    %0 = vector.load %arg0[%c0, %c0_0] : memref<16x16xf32, #tpu.memory_space<vmem>>, vector<8x16xf32>
    %c8 = arith.constant 8 : index
    %c0_1 = arith.constant 0 : index
    %1 = vector.load %arg0[%c8, %c0_1] : memref<16x16xf32, #tpu.memory_space<vmem>>, vector<8x16xf32>
    %cst = arith.constant 1.000000e-01 : f32
    %2 = vector.broadcast %cst : f32 to vector<8x16xf32>
    %3 = arith.mulf %2, %1 : vector<8x16xf32>
    %4 = arith.addf %0, %3 : vector<8x16xf32>
    %5 = arith.truncf %4 : vector<8x16xf32> to vector<8x16xbf16>
    %c0_2 = arith.constant 0 : index
    %c0_3 = arith.constant 0 : index
    %6 = vector.load %arg2[%c0_2, %c0_3] : memref<208x128xbf16, #tpu.memory_space<vmem>>, vector<16x16xbf16>
    %cst_4 = arith.constant dense<0.000000e+00> : vector<8x16xf32>
    %7 = tpu.matmul %5, %6, %cst_4 {dimension_numbers = #tpu.dot_dimension_numbers<[1], [0], [0], [1], [0, 0, 1, 1], [], []>} : vector<8x16xbf16>, vector<16x16xbf16>, vector<8x16xf32> -> vector<8x16xf32>
    %c0_5 = arith.constant 0 : index
    %c0_6 = arith.constant 0 : index
    %8 = vector.load %arg1[%c0_5, %c0_6] : memref<8x128xf32, #tpu.memory_space<vmem>>, vector<1x16xf32>
    %9 = vector.broadcast %8 : vector<1x16xf32> to vector<8x16xf32>
    %10 = arith.addf %7, %9 : vector<8x16xf32>
    %cst_7 = arith.constant 0.000000e+00 : f32
    %11 = vector.broadcast %cst_7 : f32 to vector<8x16xf32>
    %12 = arith.cmpf oge, %10, %11 : vector<8x16xf32>
    %cst_8 = arith.constant 0.00999999977 : f32
    %13 = vector.broadcast %cst_8 : f32 to vector<8x16xf32>
    %14 = arith.mulf %13, %10 : vector<8x16xf32>
    %15 = arith.select %12, %10, %14 : vector<8x16xi1>, vector<8x16xf32>
    %16 = arith.truncf %15 : vector<8x16xf32> to vector<8x16xbf16>
    %c16 = arith.constant 16 : index
    %c0_9 = arith.constant 0 : index
    %17 = vector.load %arg2[%c16, %c0_9] : memref<208x128xbf16, #tpu.memory_space<vmem>>, vector<16x32xbf16>
    %cst_10 = arith.constant dense<0.000000e+00> : vector<8x32xf32>
    %18 = tpu.matmul %16, %17, %cst_10 {dimension_numbers = #tpu.dot_dimension_numbers<[1], [0], [0], [1], [0, 0, 1, 1], [], []>} : vector<8x16xbf16>, vector<16x32xbf16>, vector<8x32xf32> -> vector<8x32xf32>
    %c1 = arith.constant 1 : index
    %c0_11 = arith.constant 0 : index
    %19 = vector.load %arg1[%c1, %c0_11] : memref<8x128xf32, #tpu.memory_space<vmem>>, vector<1x32xf32>
    %20 = vector.broadcast %19 : vector<1x32xf32> to vector<8x32xf32>
    %21 = arith.addf %18, %20 : vector<8x32xf32>
    %cst_12 = arith.constant 0.000000e+00 : f32
    %22 = vector.broadcast %cst_12 : f32 to vector<8x32xf32>
    %23 = arith.cmpf oge, %21, %22 : vector<8x32xf32>
    %cst_13 = arith.constant 0.00999999977 : f32
    %24 = vector.broadcast %cst_13 : f32 to vector<8x32xf32>
    %25 = arith.mulf %24, %21 : vector<8x32xf32>
    %26 = arith.select %23, %21, %25 : vector<8x32xi1>, vector<8x32xf32>
    %27 = arith.truncf %26 : vector<8x32xf32> to vector<8x32xbf16>
    %c32 = arith.constant 32 : index
    %c0_14 = arith.constant 0 : index
    %28 = vector.load %arg2[%c32, %c0_14] : memref<208x128xbf16, #tpu.memory_space<vmem>>, vector<32x16xbf16>
    %cst_15 = arith.constant dense<0.000000e+00> : vector<8x16xf32>
    %29 = tpu.matmul %27, %28, %cst_15 {dimension_numbers = #tpu.dot_dimension_numbers<[1], [0], [0], [1], [0, 0, 1, 1], [], []>} : vector<8x32xbf16>, vector<32x16xbf16>, vector<8x16xf32> -> vector<8x16xf32>
    %c2 = arith.constant 2 : index
    %c0_16 = arith.constant 0 : index
    %30 = vector.load %arg1[%c2, %c0_16] : memref<8x128xf32, #tpu.memory_space<vmem>>, vector<1x16xf32>
    %31 = vector.broadcast %30 : vector<1x16xf32> to vector<8x16xf32>
    %32 = arith.addf %29, %31 : vector<8x16xf32>
    %cst_17 = arith.constant 0.000000e+00 : f32
    %33 = vector.broadcast %cst_17 : f32 to vector<8x16xf32>
    %34 = arith.cmpf oge, %32, %33 : vector<8x16xf32>
    %cst_18 = arith.constant 0.00999999977 : f32
    %35 = vector.broadcast %cst_18 : f32 to vector<8x16xf32>
    %36 = arith.mulf %35, %32 : vector<8x16xf32>
    %37 = arith.select %34, %32, %36 : vector<8x16xi1>, vector<8x16xf32>
    %38 = arith.truncf %37 : vector<8x16xf32> to vector<8x16xbf16>
    %c64 = arith.constant 64 : index
    %c0_19 = arith.constant 0 : index
    %39 = vector.load %arg2[%c64, %c0_19] : memref<208x128xbf16, #tpu.memory_space<vmem>>, vector<16x8xbf16>
    %cst_20 = arith.constant dense<0.000000e+00> : vector<8x8xf32>
    %40 = tpu.matmul %38, %39, %cst_20 {dimension_numbers = #tpu.dot_dimension_numbers<[1], [0], [0], [1], [0, 0, 1, 1], [], []>} : vector<8x16xbf16>, vector<16x8xbf16>, vector<8x8xf32> -> vector<8x8xf32>
    %c3 = arith.constant 3 : index
    %c0_21 = arith.constant 0 : index
    %41 = vector.load %arg1[%c3, %c0_21] : memref<8x128xf32, #tpu.memory_space<vmem>>, vector<1x8xf32>
    %42 = vector.broadcast %41 : vector<1x8xf32> to vector<8x8xf32>
    %43 = arith.addf %40, %42 : vector<8x8xf32>
    %cst_22 = arith.constant 0.000000e+00 : f32
    %44 = vector.broadcast %cst_22 : f32 to vector<8x8xf32>
    %45 = arith.cmpf oge, %43, %44 : vector<8x8xf32>
    %cst_23 = arith.constant 0.00999999977 : f32
    %46 = vector.broadcast %cst_23 : f32 to vector<8x8xf32>
    %47 = arith.mulf %46, %43 : vector<8x8xf32>
    %48 = arith.select %45, %43, %47 : vector<8x8xi1>, vector<8x8xf32>
    %49 = arith.truncf %48 : vector<8x8xf32> to vector<8x8xbf16>
    %cst_24 = arith.constant 0.000000e+00 : bf16
    %50 = vector.broadcast %cst_24 : bf16 to vector<8x8xbf16>
    %51 = tpu.concatenate %49, %50 in 1 : vector<8x8xbf16>, vector<8x8xbf16> -> vector<8x16xbf16>
    %c80 = arith.constant 80 : index
    %c0_25 = arith.constant 0 : index
    %52 = vector.load %arg2[%c80, %c0_25] : memref<208x128xbf16, #tpu.memory_space<vmem>>, vector<16x48xbf16>
    %cst_26 = arith.constant dense<0.000000e+00> : vector<8x48xf32>
    %53 = tpu.matmul %51, %52, %cst_26 {dimension_numbers = #tpu.dot_dimension_numbers<[1], [0], [0], [1], [0, 0, 1, 1], [], []>} : vector<8x16xbf16>, vector<16x48xbf16>, vector<8x48xf32> -> vector<8x48xf32>
    %c4 = arith.constant 4 : index
    %c0_27 = arith.constant 0 : index
    %54 = vector.load %arg1[%c4, %c0_27] : memref<8x128xf32, #tpu.memory_space<vmem>>, vector<1x48xf32>
    %55 = vector.broadcast %54 : vector<1x48xf32> to vector<8x48xf32>
    %56 = arith.addf %53, %55 : vector<8x48xf32>
    %cst_28 = arith.constant 0.000000e+00 : f32
    %57 = vector.broadcast %cst_28 : f32 to vector<8x48xf32>
    %58 = arith.cmpf oge, %56, %57 : vector<8x48xf32>
    %cst_29 = arith.constant 0.00999999977 : f32
    %59 = vector.broadcast %cst_29 : f32 to vector<8x48xf32>
    %60 = arith.mulf %59, %56 : vector<8x48xf32>
    %61 = arith.select %58, %56, %60 : vector<8x48xi1>, vector<8x48xf32>
    %62 = arith.truncf %61 : vector<8x48xf32> to vector<8x48xbf16>
    %c96 = arith.constant 96 : index
    %c0_30 = arith.constant 0 : index
    %63 = vector.load %arg2[%c96, %c0_30] : memref<208x128xbf16, #tpu.memory_space<vmem>>, vector<48x64xbf16>
    %cst_31 = arith.constant dense<0.000000e+00> : vector<8x64xf32>
    %64 = tpu.matmul %62, %63, %cst_31 {dimension_numbers = #tpu.dot_dimension_numbers<[1], [0], [0], [1], [0, 0, 1, 1], [], []>} : vector<8x48xbf16>, vector<48x64xbf16>, vector<8x64xf32> -> vector<8x64xf32>
    %c5 = arith.constant 5 : index
    %c0_32 = arith.constant 0 : index
    %65 = vector.load %arg1[%c5, %c0_32] : memref<8x128xf32, #tpu.memory_space<vmem>>, vector<1x64xf32>
    %66 = vector.broadcast %65 : vector<1x64xf32> to vector<8x64xf32>
    %67 = arith.addf %64, %66 : vector<8x64xf32>
    %cst_33 = arith.constant 0.000000e+00 : f32
    %68 = vector.broadcast %cst_33 : f32 to vector<8x64xf32>
    %69 = arith.cmpf oge, %67, %68 : vector<8x64xf32>
    %cst_34 = arith.constant 0.00999999977 : f32
    %70 = vector.broadcast %cst_34 : f32 to vector<8x64xf32>
    %71 = arith.mulf %70, %67 : vector<8x64xf32>
    %72 = arith.select %69, %67, %71 : vector<8x64xi1>, vector<8x64xf32>
    %73 = arith.truncf %72 : vector<8x64xf32> to vector<8x64xbf16>
    %c144 = arith.constant 144 : index
    %c0_35 = arith.constant 0 : index
    %74 = vector.load %arg2[%c144, %c0_35] : memref<208x128xbf16, #tpu.memory_space<vmem>>, vector<64x17xbf16>
    %cst_36 = arith.constant dense<0.000000e+00> : vector<8x17xf32>
    %75 = tpu.matmul %73, %74, %cst_36 {dimension_numbers = #tpu.dot_dimension_numbers<[1], [0], [0], [1], [0, 0, 1, 1], [], []>} : vector<8x64xbf16>, vector<64x17xbf16>, vector<8x17xf32> -> vector<8x17xf32>
    %c6 = arith.constant 6 : index
    %c0_37 = arith.constant 0 : index
    %76 = vector.load %arg1[%c6, %c0_37] : memref<8x128xf32, #tpu.memory_space<vmem>>, vector<1x17xf32>
    %77 = vector.broadcast %76 : vector<1x17xf32> to vector<8x17xf32>
    %78 = arith.addf %75, %77 : vector<8x17xf32>
    %79 = tpu.iota {dimensions = array<i32: 1>} : vector<8x17xi32>
    %c16_i32 = arith.constant 16 : i32
    %80 = vector.broadcast %c16_i32 : i32 to vector<8x17xi32>
    %81 = arith.cmpi slt, %79, %80 : vector<8x17xi32>
    %cst_38 = arith.constant 0.000000e+00 : f32
    %82 = vector.broadcast %cst_38 : f32 to vector<8x17xf32>
    %83 = arith.cmpf oge, %78, %82 : vector<8x17xf32>
    %cst_39 = arith.constant 0.00999999977 : f32
    %84 = vector.broadcast %cst_39 : f32 to vector<8x17xf32>
    %85 = arith.mulf %84, %78 : vector<8x17xf32>
    %86 = arith.select %83, %78, %85 : vector<8x17xi1>, vector<8x17xf32>
    %87 = arith.negf %78 : vector<8x17xf32>
    %88 = math.exp %87 : vector<8x17xf32>
    %cst_40 = arith.constant 1.000000e+00 : f32
    %89 = vector.broadcast %cst_40 : f32 to vector<8x17xf32>
    %90 = arith.addf %89, %88 : vector<8x17xf32>
    %91 = arith.divf %89, %90 : vector<8x17xf32>
    %92 = arith.select %81, %86, %91 : vector<8x17xi1>, vector<8x17xf32>
    %cst_41 = arith.constant 0.000000e+00 : f32
    %93 = vector.broadcast %cst_41 : f32 to vector<8x103xf32>
    %94 = tpu.concatenate %92, %48, %93 in 1 : vector<8x17xf32>, vector<8x8xf32>, vector<8x103xf32> -> vector<8x128xf32>
    %c0_42 = arith.constant 0 : index
    %c0_43 = arith.constant 0 : index
    %95 = vector.load %arg3[%c0_42, %c0_43] : memref<8x128xf32, #tpu.memory_space<vmem>>, vector<8x128xf32>
    tpu.vector_store %arg3[%c0_42, %c0_43], %94 {strides = array<i32>} : memref<8x128xf32, #tpu.memory_space<vmem>>, vector<8x128xf32>,
    return
  }
}

</mosaic_0001>

<bundles_post_ra>
// kernel: aae_gcn_forward.1
= control target key start
LH: loop header
LB: loop body
LE: loop exit
PB: predicated region body
PF: predicated region fallthrough
CT: control target
= control target key end

     0   :  { %v639_v0 = vmov 0.0   ;;  %vm640_vm0 = vmmov 0   ;;  %vm33_vm1 = vcmask 130048   ;;  %vm162_vm4 = vcmask 261120   ;;  %s641_s10 = smov 17   ;;  %s762_s2 = inlined_call_operand.vmem [shape: bf16[208,128], index: 2, kind: input, shape index: {}]   ;;  %s763_s0 = inlined_call_operand.vmem [shape: f32[16,16], index: 0, kind: input, shape index: {}]   ;;  %s764_s1 = inlined_call_operand.vmem [shape: f32[8,128], index: 1, kind: input, shape index: {}]   ;;  %s765_s3 = inlined_call_operand.vmem [shape: f32[8,128], index: 3, kind: output, shape index: {}]  }
   0x1   :  { %565 = vmatprep.subr.bf16.mxu1 %v639_v0  ;;  %v622_v1 = vld [vmem:[%s762_s2] sm:$0xff]   ;;  %567 = vmatprep.mubr.msk.bf16.mxu1 %vm640_vm0, %v639_v0  ;;  %v16_v3 = vld [vmem:[%s763_s0 + $0x8] sm:$0xff]  ;;  %v624_v17 = vld [vmem:[%s762_s2 + $0x18] sm:$0xff]   ;;  %vm270_vm7 = vcmask 64512   ;;  %vm362_vm9 = vcmask 392192   ;;  %vm447_vm11 = vcmask 523264  }
   0x2   :  { %v15_v2 = vld [vmem:[%s763_s0] sm:$0xff]  ;;  %577 = vmatprep.subr.bf16.mxu0 %v639_v0  ;;  %581 = vmatprep.mubr.msk.bf16.mxu0 %vm640_vm0, %v639_v0  ;;  %v17_v4 = vmul.f32 0.1, %v16_v3  ;;  %v623_v7 = vld [vmem:[%s762_s2 + $0x8] sm:$0xff]   ;;  %v625_v18 = vld [vmem:[%s762_s2 + $0x10] sm:$0xff]   ;;  %vm508_vm14 = vcmask 138240  }
   0x3   :  { %566 = vmatpush3.bf16.msra.mxu1 %v622_v1  ;;  %v517_v8 = vld [vmem:[%s764_s1] ss:$0 sm:$0xff]  ;;  %578 = vmatpush3.bf16.msra.mxu0 %v624_v17  ;;  %v520_v19 = vld [vmem:[%s764_s1 + $0x1] ss:$0 sm:$0xff]  ;;  %v523_v29 = vld [vmem:[%s764_s1 + $0x2] ss:$0 sm:$0xff] }
   0x4   :  { %571 = vmatprep.subr.bf16.mxu1 %v639_v0  ;;  %v18_v5 = vadd.f32 %v17_v4, %v15_v2  ;;  %579 = vmatprep.subr.bf16.mxu0 %v639_v0  ;;  %v626_v28 = vld [vmem:[%s762_s2 + $0x20] sm:$0xff]   ;;  %v627_v38 = vld [vmem:[%s762_s2 + $0x28] sm:$0xff]   ;;  %v629_v50 = vld [vmem:[%s762_s2 + $0x38] sm:$0xff]   ;;  %vm510_vm15 = vcmask 203776  }
   0x5   :  { %v628_v39 = vld [vmem:[%s762_s2 + $0x40] sm:$0xff]   ;;  %v630_v51 = vld [vmem:[%s762_s2 + $0x30] sm:$0xff]   ;;  %v632_v53 = vld [vmem:[%s762_s2 + $0x58] sm:$0xff]  }
   0x6   :  { %v19_v6 = vpack.c.bf16 %v18_v5, %v18_v5  ;;  %v527_v40 = vld [vmem:[%s764_s1 + $0x3] ss:$0 sm:$0xff]  ;;  %v530_v54 = vld [vmem:[%s764_s1 + $0x4] ss:$0 sm:$0xff]  ;;  %v633_v63 = vld [vmem:[%s762_s2 + $0x50] sm:$0xff]  }
   0x7   :  { %580 = vmatpush3.bf16.msra.mxu0 %v625_v18  ;;  %v631_v52 = vld [vmem:[%s762_s2 + $0x60] sm:$0xff]   ;;  %v634_v1 = vld [vmem:[%s762_s2 + $0x48] sm:$0xff]  }
   0x8   :  { %568 = vmatmul.mubr.msk.bf16.vlgmr.msra.gmra.mxu1 %vm33_vm1, %v19_v6  ;;  %591 = vmatprep.subr.bf16.mxu0 %v639_v0  ;;  %v533_v2 = vld [vmem:[%s764_s1 + $0x5] ss:$0 sm:$0xff] }
   0x9   :  { %573 = vmatprep.mubr.msk.bf16.mxu1 %vm640_vm0, %v639_v0  ;;  %572 = vmatpush3.bf16.msra.mxu1 %v623_v7 }
   0xa   :  { %585 = vmatprep.subr.bf16.mxu1 %v639_v0 }
  0xc8   :  { %v71_v9 = vpop.f32.mrf.mxu1 }
  0xc9   :  { %v72_v10 = vadd.f32 %v517_v8, %v71_v9 }
  0xca   :  { %v569_v11 = vpop.f32.mrf.mxu1 }
  0xcb   :  { %vm77_vm2 = vcmp.ge.f32.partialorder %v72_v10, 0.0  ;;  %v78_v12 = vmul.f32 0.01, %v72_v10 }
  0xcc   :  { %v74_v13 = vpop.f32.mrf.mxu1 }
  0xcd   :  { %v79_v14 = vsel %vm77_vm2, %v72_v10, %v78_v12 }
  0xce   :  { %v80_v15 = vpack.c.bf16 %v79_v14, %v79_v14  ;;  %v570_v16 = vpop.f32.mrf.mxu1 }
  0xd0   :  { %574 = vmatmul.mubr.msk.bf16.vlgmr.msra.gmra.mxu1 %vm33_vm1, %v80_v15 }
  0xd1   :  { %587 = vmatprep.mubr.msk.bf16.mxu1 %vm640_vm0, %v639_v0  ;;  %586 = vmatpush3.bf16.msra.mxu1 %v626_v28 }
  0xd2   :  { %597 = vmatprep.subr.bf16.mxu1 %v639_v0 }
 0x190   :  { %v131_v20 = vpop.f32.mrf.mxu1 }
 0x191   :  { %v132_v21 = vadd.f32 %v520_v19, %v131_v20  ;;  %v491_v19 = vlaneseq }
 0x192   :  { %v575_v22 = vpop.f32.mrf.mxu1 }
 0x193   :  { %vm137_vm3 = vcmp.ge.f32.partialorder %v132_v21, 0.0  ;;  %v138_v23 = vmul.f32 0.01, %v132_v21  ;;  %v492_v20 = vand.u32 127, %v491_v19 }
 0x194   :  { %v134_v24 = vpop.f32.mrf.mxu1 }
 0x195   :  { %v139_v25 = vsel %vm137_vm3, %v132_v21, %v138_v23  ;;  %vm493_vm13 = vcmp.lt.s32.totalorder %v492_v20, 16 }
 0x196   :  { %v140_v26 = vpack.c.bf16 %v139_v25, %v139_v25  ;;  %v576_v27 = vpop.f32.mrf.mxu1 }
 0x198   :  { %582 = vmatmul.mubr.msk.bf16.vlgmr.msra.gmra.mxu0 %vm162_vm4, %v140_v26 }
 0x199   :  { %593 = vmatprep.mubr.msk.bf16.mxu0 %vm640_vm0, %v639_v0  ;;  %592 = vmatpush3.bf16.msra.mxu0 %v627_v38 }
 0x19a   :  { %607 = vmatprep.subr.bf16.mxu0 %v639_v0 }
 0x258   :  { %v200_v30 = vpop.f32.mrf.mxu0 }
 0x259   :  { %v201_v31 = vadd.f32 %v523_v29, %v200_v30 }
 0x25a   :  { %v583_v32 = vpop.f32.mrf.mxu0 }
 0x25b   :  { %vm206_vm5 = vcmp.ge.f32.partialorder %v201_v31, 0.0  ;;  %v207_v33 = vmul.f32 0.01, %v201_v31 }
 0x25c   :  { %v203_v34 = vpop.f32.mrf.mxu0 }
 0x25d   :  { %v208_v35 = vsel %vm206_vm5, %v201_v31, %v207_v33 }
 0x25e   :  { %v209_v36 = vpack.c.bf16 %v208_v35, %v208_v35  ;;  %v584_v37 = vpop.f32.mrf.mxu0 }
 0x260   :  { %588 = vmatmul.mubr.msk.bf16.vlgmr.msra.gmra.mxu1 %vm33_vm1, %v209_v36 }
 0x261   :  { %603 = vmatprep.mubr.msk.bf16.mxu1 %vm640_vm0, %v639_v0  ;;  %598 = vmatpush3.bf16.msra.mxu1 %v628_v39 }
 0x262   :  { %599 = vmatprep.subr.bf16.mxu1 %v639_v0 }
 0x265   :  { %600 = vmatpush3.bf16.msra.mxu1 %v629_v50 }
 0x266   :  { %601 = vmatprep.subr.bf16.mxu1 %v639_v0 }
 0x269   :  { %602 = vmatpush3.bf16.msra.mxu1 %v630_v51 }
 0x320   :  { %v260_v41 = vpop.f32.mrf.mxu1 }
 0x321   :  { %v261_v42 = vadd.f32 %v527_v40, %v260_v41 }
 0x322   :  { %v589_v43 = vpop.f32.mrf.mxu1 }
 0x323   :  { %vm266_vm6 = vcmp.ge.f32.partialorder %v261_v42, 0.0  ;;  %v267_v44 = vmul.f32 0.01, %v261_v42 }
 0x324   :  { %v263_v45 = vpop.f32.mrf.mxu1 }
 0x325   :  { %v268_v46 = vsel %vm266_vm6, %v261_v42, %v267_v44 }
 0x326   :  { %v590_v47 = vpop.f32.mrf.mxu1  ;;  %v269_v48 = vpack.c.bf16 %v268_v46, %v268_v46  ;;  %505 = vrot.lane.b32.xlu0 %v268_v46, %s641_s10 }
 0x328   :  { %v273_v49 = vsel %vm270_vm7, %v269_v48, 0 }
 0x329   :  { %594 = vmatmul.mubr.msk.bf16.vlgmr.msra.gmra.mxu0 %vm33_vm1, %v273_v49 }
 0x32a   :  { %615 = vmatprep.mubr.msk.bf16.mxu0 %vm640_vm0, %v639_v0  ;;  %608 = vmatpush3.bf16.msra.mxu0 %v631_v52 }
 0x32b   :  { %609 = vmatprep.subr.bf16.mxu0 %v639_v0 }
 0x32e   :  { %610 = vmatpush3.bf16.msra.mxu0 %v632_v53 }
 0x32f   :  { %611 = vmatprep.subr.bf16.mxu0 %v639_v0 }
 0x332   :  { %612 = vmatpush3.bf16.msra.mxu0 %v633_v63 }
 0x333   :  { %613 = vmatprep.subr.bf16.mxu0 %v639_v0  ;;  %v538_v0 = vld [vmem:[%s764_s1 + $0x6] ss:$0 sm:$0xff] }
 0x336   :  { %614 = vmatpush3.bf16.msra.mxu0 %v634_v1 }
 0x398   :  { %v506_v24 = vpop.permute.xlu0 %505 }
 0x3e9   :  { %v323_v55 = vpop.f32.mrf.mxu0 }
 0x3ea   :  { %v324_v56 = vadd.f32 %v530_v54, %v323_v55 }
 0x3eb   :  { %v595_v57 = vpop.f32.mrf.mxu0 }
 0x3ec   :  { %vm329_vm8 = vcmp.ge.f32.partialorder %v324_v56, 0.0  ;;  %v330_v58 = vmul.f32 0.01, %v324_v56 }
 0x3ed   :  { %v326_v59 = vpop.f32.mrf.mxu0 }
 0x3ee   :  { %v331_v60 = vsel %vm329_vm8, %v324_v56, %v330_v58 }
 0x3ef   :  { %v332_v61 = vpack.c.bf16 %v331_v60, %v331_v60  ;;  %v596_v62 = vpop.f32.mrf.mxu0 }
 0x3f1   :  { %604 = vmatmul.mubr.msk.bf16.vlgmr.msra.gmra.mxu1 %vm362_vm9, %v332_v61 }
 0x4b1   :  { %v400_v3 = vpop.f32.mrf.mxu1 }
 0x4b2   :  { %v401_v4 = vadd.f32 %v533_v2, %v400_v3 }
 0x4b3   :  { %v605_v5 = vpop.f32.mrf.mxu1 }
 0x4b4   :  { %vm406_vm10 = vcmp.ge.f32.partialorder %v401_v4, 0.0  ;;  %v407_v6 = vmul.f32 0.01, %v401_v4 }
 0x4b5   :  { %v403_v7 = vpop.f32.mrf.mxu1 }
 0x4b6   :  { %v408_v8 = vsel %vm406_vm10, %v401_v4, %v407_v6 }
 0x4b7   :  { %v409_v9 = vpack.c.bf16 %v408_v8, %v408_v8  ;;  %v606_v10 = vpop.f32.mrf.mxu1 }
 0x4b9   :  { %616 = vmatmul.mubr.msk.bf16.vlgmr.msra.gmra.mxu0 %vm447_vm11, %v409_v9 }
 0x579   :  { %v485_v11 = vpop.f32.mrf.mxu0 }
 0x57a   :  { %v486_v12 = vadd.f32 %v538_v0, %v485_v11 }
 0x57b   :  { %v617_v13 = vpop.f32.mrf.mxu0 }
 0x57c   :  { %v544_v14 = vmul.f32 -1.442695, %v486_v12  ;;  %v495_v21 = vmul.f32 0.01, %v486_v12  ;;  %vm494_vm12 = vcmp.ge.f32.partialorder %v486_v12, 0.0 }
 0x57d   :  { %v488_v15 = vpop.f32.mrf.mxu0 }
 0x57e   :  { %635 = vpow2.f32 %v544_v14  ;;  %v496_v23 = vsel %vm494_vm12, %v486_v12, %v495_v21 }
 0x57f   :  { %v618_v16 = vpop.f32.mrf.mxu0 }
 0x58b   :  { %v636_v17 = vpop.eup %635 }
 0x58c   :  { %v500_v18 = vadd.f32 1.0, %v636_v17 }
 0x58e   :  { %637 = vrcp.f32 %v500_v18 }
 0x59b   :  { %v638_v22 = vpop.eup %637 }
 0x59c   :  { %v503_v25 = vsel %vm493_vm13, %v496_v23, %v638_v22 }
 0x59d   :  { %v509_v26 = vsel %vm508_vm14, %v503_v25, %v506_v24 }
 0x59e   :  { %v511_v27 = vsel %vm510_vm15, %v509_v26, 0.0 }
 0x59f   :  { %512 = vst [vmem:[%s765_s3] sm:$0xff] %v511_v27 }

</bundles_post_ra>
